<compile_context>
chip_gen: v7x
topology: tpu7x:2x2x1
jax: 0.10.0
libtpu: 0.0.40
codegen_flags: <defaults>
</compile_context>

<pallas_src>
import jax
import jax.numpy as jnp
import numpy as np
from jax.experimental import pallas as pl
from jax.experimental.pallas import tpu as pltpu


def deconv_forward(x1, x2):
    """deconv.forward(x1, x2): x2 is unused, the result is x1 unchanged.

    Zero-cost identity — no kernel, no DMA, no extra HBM traffic.
    """
    del x2  # unused by the module's forward
    return x1


def _hbm_copy_kernel(x_hbm, o_hbm, sem):
    # Single direct HBM->HBM DMA of the whole buffer; no VMEM staging.
    cp = pltpu.make_async_copy(x_hbm, o_hbm, sem)
    cp.start()
    cp.wait()


def deconv_forward_pallas(x1, x2):
    """Pedagogical Pallas version of the identity forward.

    Materializes a fresh copy of x1 via one HBM->HBM DMA (useful only if the
    caller actually needs a new buffer; otherwise use `deconv_forward`).
    """
    del x2  # unused by the module's forward; no DMA is ever generated for it.

    if x1.size == 0:
        return x1

    nbytes = x1.size * jnp.dtype(x1.dtype).itemsize

    return pl.pallas_call(
        _hbm_copy_kernel,
        out_shape=jax.ShapeDtypeStruct(x1.shape, x1.dtype),
        in_specs=[pl.BlockSpec(memory_space=pl.ANY)],   # stay in HBM
        out_specs=pl.BlockSpec(memory_space=pl.ANY),    # stay in HBM
        scratch_shapes=[pltpu.SemaphoreType.DMA(())],
        cost_estimate=pl.CostEstimate(
            flops=0, transcendentals=0, bytes_accessed=2 * nbytes),
    )(x1)


if __name__ == "__main__":
    # deconv.__init__(ci, co) defines no parameters -> nothing to initialize.
    ci, co = 4, 4  # nominal in/out channels (unused by the module)
    key = jax.random.PRNGKey(0)
    k1, k2 = jax.random.split(key)
    x1 = jax.random.normal(k1, (2, ci, 16, 16), dtype=jnp.float32)
    x2 = jax.random.normal(k2, (2, co, 16, 16), dtype=jnp.float32)

    expected = np.asarray(jax.device_get(x1))

    # Production path: zero-cost identity (the kernel is elided entirely).
    out = deconv_forward(x1, x2)
    jax.block_until_ready(out)
    assert out.shape == expected.shape
    assert out.dtype == expected.dtype
    assert np.array_equal(np.asarray(jax.device_get(out)), expected)

    # Pedagogical Pallas path: single HBM->HBM DMA copy.
    out_pallas = deconv_forward_pallas(x1, x2)
    jax.block_until_ready(out_pallas)
    assert out_pallas.shape == expected.shape
    assert out_pallas.dtype == expected.dtype
    assert np.array_equal(np.asarray(jax.device_get(out_pallas)), expected)

    print("KERNEL_OK")
</pallas_src>

<mosaic_0001>
module attributes {stable_mosaic.version = 11 : i64} {
  func.func @_hbm_copy_kernel(%arg0: memref<2x4x16x16xf32, #tpu.memory_space<any>>, %arg1: memref<2x4x16x16xf32, #tpu.memory_space<any>>, %arg2: memref<!tpu.dma_semaphore, #tpu.memory_space<semaphore_mem>>) attributes {dimension_semantics = [], scalar_prefetch = 0 : i64, scratch_operands = 1 : i64, tpu.core_type = #tpu.core_type<tc>} {
    tpu.enqueue_dma source(%arg0 : memref<2x4x16x16xf32, #tpu.memory_space<any>>) target(%arg1 : memref<2x4x16x16xf32, #tpu.memory_space<any>>) target_semaphore(%arg2 : memref<!tpu.dma_semaphore, #tpu.memory_space<semaphore_mem>>)
    tpu.wait_dma2 semaphore(%arg2 : memref<!tpu.dma_semaphore, #tpu.memory_space<semaphore_mem>>) src(%arg0 : memref<2x4x16x16xf32, #tpu.memory_space<any>>) dst(%arg1 : memref<2x4x16x16xf32, #tpu.memory_space<any>>)
    return
  }
}

</mosaic_0001>

<bundles_post_ra>
// kernel: tpu_custom_call.1
= control target key start
LH: loop header
LB: loop body
LE: loop exit
PB: predicated region body
PF: predicated region fallthrough
CT: control target
= control target key end

     0   :  { %s36_s6 = smov [#allocation2]   ;;  %s37_s7 = smov [#allocation3]   ;;  %s55_s0 = inlined_call_operand.hbm [shape: f32[2,4,16,16], index: 0, kind: input, shape index: {}]   ;;  %s56_s1 = inlined_call_operand.hbm [shape: f32[2,4,16,16], index: 1, kind: output, shape index: {}]  }
   0x1   :  { %s38_s8 = smov 0  }
   0x2   :  { %18 = dma.general %s55_s0, 2048, %s56_s1, %s36_s6, %s37_s7, [#allocation4], %s38_s8, 0  }
   0x3   :  { %34 = dma.done.wait [#allocation2], 2048 }
   0x4   :  { %35 = vsyncadd [#allocation2], 4294965248 }
   0x5   :  { %24 = vsyncmov [#allocation2] }
   0x8   :  { %s25_s13 = vpop.sfrf %24 }
   0x9   :  { %p30_p0 = scmp.ne.s32.totalorder %s25_s13, 0 }
   0xb   :  { %29 = shalt.err (%p30_p0)  }

</bundles_post_ra>
